<compile_context>
chip_gen: v5e
topology: v5e:2x2
jax: 0.10.0
libtpu: 0.0.40
codegen_flags: <defaults>
</compile_context>

<pallas_src>
import functools

import jax
import jax.numpy as jnp
from jax.experimental import pallas as pl
from jax.experimental.pallas import tpu as pltpu


def _round_up(x, m):
    return ((x + m - 1) // m) * m


def _tpu_generation():
    """Best-effort TPU generation detection (5 / 6 / 7); defaults to 6."""
    try:
        kind = jax.devices()[0].device_kind.lower()
    except Exception:  # pragma: no cover - defensive
        return 6
    if "v5" in kind or "5 lite" in kind:
        return 5
    if "v6" in kind or "trillium" in kind:
        return 6
    if "v7" in kind or "7x" in kind:
        return 7
    return 6


def _pick_c_out_tile(c_out, l_tile, mxu_m, budget_bytes=2 << 20):
    """Largest divisor of C_out (multiple of 8, preferring multiples of the MXU
    M width) whose f32 result tile fits the budget."""
    if c_out <= mxu_m or c_out % 8 != 0:
        return c_out
    cap = max(8, min(c_out, (budget_bytes // (4 * l_tile)) // 8 * 8))
    best = None
    for cand in range(cap, 7, -8):
        if c_out % cand == 0:
            if cand % mxu_m == 0:
                return cand
            if best is None:
                best = cand
    return best if best is not None else c_out


def _conv1d_elu_kernel(*refs, kernel_size, dilation, halo_width, act_dtype):
    """One (C_out-tile, batch, L-tile) grid step: K tap dots + bias + ELU."""
    if halo_width > 0:
        x_ref, halo_ref, w_ref, b_ref, o_ref = refs
    else:
        x_ref, w_ref, b_ref, o_ref = refs

    cur = x_ref[0]                                   # (C_in, L_tile), input dtype
    l_tile = cur.shape[-1]

    def tap_dot(t, win):
        w_t = w_ref[t]                               # (C_out_t, C_in) bf16
        return jnp.dot(w_t, win.astype(w_t.dtype),
                       preferred_element_type=jnp.float32)

    # ---- Bulk: exact for lanes [halo_width, L_tile).  The wrapped first lanes
    # (roll brings tail data around) are overwritten by the head pass below.
    acc = tap_dot(kernel_size - 1, cur)              # shift-0 tap
    for t in range(kernel_size - 1):
        s = ((kernel_size - 1 - t) * dilation) % l_tile
        win = cur if s == 0 else pltpu.roll(cur, s, axis=1)
        acc = acc + tap_dot(t, win)

    bias = b_ref[...].astype(jnp.float32)            # (C_out_t, 1)

    def epilogue(a):                                 # f32 bias, then ELU(alpha=1)
        a = (a + bias).astype(act_dtype)
        neg = jnp.minimum(a, 0)
        return jnp.where(a > 0, a, jnp.exp(neg) - 1).astype(o_ref.dtype)

    o_ref[0] = epilogue(acc)

    # ---- Head: the first halo_width lanes need the causal halo; recompute them
    # exactly from a tiny (C_in, 2*H) window and overwrite the bulk result.
    if halo_width > 0:
        halo = halo_ref[0, 0]                        # (C_in, H): samples just before tile
        head_src = jnp.concatenate([halo, cur[:, :halo_width]], axis=1)  # (C_in, 2H)
        acc_h = tap_dot(kernel_size - 1, head_src[:, halo_width:2 * halo_width])
        for t in range(kernel_size - 1):
            s = (kernel_size - 1 - t) * dilation
            acc_h = acc_h + tap_dot(t, head_src[:, halo_width - s:2 * halo_width - s])
        o_ref[0, :, :halo_width] = epilogue(acc_h)


def causal_conv1d_elu(x, v, g, b, *, kernel_size, stride=1, dilation=1, groups=1,
                      l_tile=1024, out_dtype=jnp.bfloat16):
    """Forward of SEANet Conv1d: weight_norm Conv1d with causal left pad + ELU.

    x: (N, C_in, L);  v: (C_out, C_in, K);  g, b: (C_out,).
    Pass out_dtype=jnp.float32 to reproduce the module's f32 output exactly.
    """
    assert stride == 1, "stride != 1 unused by this module's defaults"  # TODO(synk): strided conv
    assert groups == 1, "grouped conv not implemented"                  # TODO(synk): groups > 1

    n, c_in, length = x.shape
    c_out, _, k = v.shape
    assert k == kernel_size
    pad_left = (kernel_size - 1) * dilation
    gen = _tpu_generation()

    # weight_norm(dim=0): w[o] = g[o] * v[o] / ||v[o]||   (f32 math, no eps).
    v32 = v.astype(jnp.float32)
    norm = jnp.sqrt(jnp.sum(v32 * v32, axis=(1, 2), keepdims=True))
    w = g.astype(jnp.float32)[:, None, None] * v32 / norm               # (C_out, C_in, K)
    w3 = jnp.transpose(w, (2, 0, 1)).astype(jnp.bfloat16)               # (K, C_out, C_in)
    b2 = b.reshape(c_out, 1).astype(jnp.float32)

    # Lane-dense L tiling; tile at least as wide as the 128-aligned halo window.
    halo_w = _round_up(pad_left, 128) if pad_left > 0 else 0
    l_tile = max(128, min(int(l_tile), _round_up(length, 128)))
    l_tile = max(_round_up(l_tile, 128), halo_w)
    n_l = pl.cdiv(length, l_tile)

    mxu_m = 128 if gen <= 5 else 256
    c_out_tile = _pick_c_out_tile(c_out, l_tile, mxu_m)
    n_co = c_out // c_out_tile

    act_dtype = (jnp.bfloat16
                 if gen >= 6 and jnp.dtype(out_dtype) == jnp.dtype(jnp.bfloat16)
                 else jnp.float32)

    # Grid: (C_out tiles, batch, L tiles).  Weights/bias are constant along the
    # two inner axes -> fetched only n_co times; x/out stream along the inner axis.
    operands = [x]
    # TODO(synk): pipeline_mode=pl.Buffered(3) on the x stream once verified stable.
    in_specs = [pl.BlockSpec((1, c_in, l_tile), lambda co, i, j: (i, 0, j))]

    if pad_left > 0:
        # Thin halo: for every L-tile, the halo_w samples immediately preceding it
        # (zeros before position 0 = the causal pad).  Only ~halo_w/l_tile extra reads.
        pos = (jnp.arange(n_l) * l_tile - halo_w)[:, None] + jnp.arange(halo_w)[None, :]
        halo = jnp.where((pos >= 0)[None, None],
                         x[:, :, jnp.clip(pos, 0, length - 1)], 0).astype(x.dtype)
        halo = jnp.transpose(halo, (0, 2, 1, 3))                        # (N, n_l, C_in, H)
        operands.append(halo)
        in_specs.append(pl.BlockSpec((1, 1, c_in, halo_w), lambda co, i, j: (i, j, 0, 0)))

    operands += [w3, b2]
    in_specs += [
        pl.BlockSpec((kernel_size, c_out_tile, c_in), lambda co, i, j: (0, co, 0)),
        pl.BlockSpec((c_out_tile, 1), lambda co, i, j: (co, 0)),
    ]
    out_spec = pl.BlockSpec((1, c_out_tile, l_tile), lambda co, i, j: (i, co, j))

    # VMEM budget: double-buffered streams + resident weights + in-kernel temps,
    # with margin; capped per generation (48 MiB on v7x, ~100 MiB on v5e/v6e).
    xi = x.dtype.itemsize
    oi = jnp.dtype(out_dtype).itemsize
    ci8 = max(c_in, 8)
    est = 2 * (ci8 * l_tile * xi + ci8 * halo_w * xi
               + kernel_size * c_out_tile * 128 * 2 + c_out_tile * 128 * 4
               + c_out_tile * l_tile * oi)
    est += 3 * ci8 * l_tile * 4                      # rolled tap / bf16 cast temps
    est += 3 * c_out_tile * l_tile * 4               # f32 accumulator + epilogue temps
    est += ci8 * 2 * max(halo_w, 128) * 4 + c_out_tile * max(halo_w, 128) * 4
    vmem_cap = (48 << 20) if gen >= 7 else (100 << 20)
    vmem_limit = int(min(max(2 * est, 32 << 20), vmem_cap))

    kernel = functools.partial(_conv1d_elu_kernel, kernel_size=kernel_size,
                               dilation=dilation, halo_width=halo_w,
                               act_dtype=act_dtype)

    return pl.pallas_call(
        kernel,
        out_shape=jax.ShapeDtypeStruct((n, c_out, length), out_dtype),
        grid=(n_co, n, n_l),
        in_specs=in_specs,
        out_specs=out_spec,
        compiler_params=pltpu.CompilerParams(
            # Every output block is written exactly once -> all axes parallel.
            # TODO(synk): explicit CORE_PARALLEL split over C_out/L tiles for
            # single-batch inference on v7x if a trace shows one TensorCore idle.
            # TODO(synk): fold several batch elements per grid step for very small
            # C_in to fatten per-step DMAs / MXU occupancy.
            dimension_semantics=("parallel", "parallel", "parallel"),
            vmem_limit_bytes=vmem_limit),
    )(*operands)


def _reference(x, v, g, b, *, kernel_size, dilation=1):
    """Pure-JAX (f32) reference of the PyTorch forward for verification."""
    v32 = v.astype(jnp.float32)
    norm = jnp.sqrt(jnp.sum(v32 * v32, axis=(1, 2), keepdims=True))
    w = g[:, None, None] * v32 / norm
    pad_left = (kernel_size - 1) * dilation
    x_pad = jnp.pad(x, ((0, 0), (0, 0), (pad_left, 0)))
    y = jax.lax.conv_general_dilated(
        x_pad, w, window_strides=(1,), padding="VALID",
        rhs_dilation=(dilation,), dimension_numbers=("NCH", "OIH", "NCH"))
    y = y + b[None, :, None]
    return jnp.where(y > 0, y, jnp.expm1(y))


if __name__ == "__main__":
    key = jax.random.PRNGKey(0)

    configs = [
        # (N, C_in, C_out, K, dilation, L, l_tile, out_dtype)
        (2, 4, 8, 3, 1, 16, 1024, jnp.bfloat16),    # module defaults, tiny shape
        (1, 8, 16, 7, 3, 300, 128, jnp.bfloat16),   # dilated, 3 L tiles + partial tail
        (1, 4, 8, 3, 9, 700, 256, jnp.bfloat16),    # bulk + head paths both live
        (2, 8, 16, 1, 1, 200, 128, jnp.float32),    # pointwise conv (no halo), f32 out
    ]
    for idx, (n, c_in, c_out, k, dil, length, lt, odt) in enumerate(configs):
        key, kx, kv, kg, kb = jax.random.split(key, 5)
        x = jax.random.normal(kx, (n, c_in, length), dtype=jnp.float32)
        v = jax.random.normal(kv, (c_out, c_in, k), dtype=jnp.float32) * 0.1
        g = jax.random.uniform(kg, (c_out,), dtype=jnp.float32, minval=0.5, maxval=1.5)
        b = jax.random.normal(kb, (c_out,), dtype=jnp.float32) * 0.1

        y = causal_conv1d_elu(x, v, g, b, kernel_size=k, dilation=dil,
                              l_tile=lt, out_dtype=odt)
        y = jax.block_until_ready(y)
        y_ref = _reference(x, v, g, b, kernel_size=k, dilation=dil)

        assert y.shape == (n, c_out, length), (idx, y.shape)
        assert y.dtype == jnp.dtype(odt), (idx, y.dtype)
        err = float(jnp.max(jnp.abs(y.astype(jnp.float32) - y_ref)))
        # bf16 MXU operands / bf16 output -> relaxed tolerance vs the f32 reference.
        assert jnp.allclose(y.astype(jnp.float32), y_ref, atol=3e-2, rtol=3e-2), (idx, err)

    print("KERNEL_OK")
</pallas_src>

<mosaic_0001>
module attributes {stable_mosaic.version = 11 : i64} {
  func.func @_conv1d_elu_kernel(%arg0: i32, %arg1: i32, %arg2: i32, %arg3: memref<1x4x128xf32, #tpu.memory_space<vmem>>, %arg4: memref<1x1x4x128xf32, #tpu.memory_space<vmem>>, %arg5: memref<3x8x4xbf16, #tpu.memory_space<vmem>>, %arg6: memref<8x1xf32, #tpu.memory_space<vmem>>, %arg7: memref<1x8x128xbf16, #tpu.memory_space<vmem>>) attributes {dimension_semantics = [#tpu.dimension_semantics<parallel>, #tpu.dimension_semantics<parallel>, #tpu.dimension_semantics<parallel>], iteration_bounds = array<i64: 1, 2, 1>, scalar_prefetch = 0 : i64, scratch_operands = 0 : i64, tpu.core_type = #tpu.core_type<tc>, window_params = [{transform_indices = @transform_0, window_bounds = array<i64: 1, 4, 128>}, {transform_indices = @transform_1, window_bounds = array<i64: 1, 1, 4, 128>}, {transform_indices = @transform_2, window_bounds = array<i64: 3, 8, 4>}, {transform_indices = @transform_3, window_bounds = array<i64: 8, 1>}, {transform_indices = @transform_4, window_bounds = array<i64: 1, 8, 128>}]} {
    %c0 = arith.constant 0 : index
    %c0_0 = arith.constant 0 : index
    %c0_1 = arith.constant 0 : index
    %0 = vector.load %arg3[%c0, %c0_0, %c0_1] : memref<1x4x128xf32, #tpu.memory_space<vmem>>, vector<1x4x128xf32>
    %1 = vector.shape_cast %0 : vector<1x4x128xf32> to vector<4x128xf32>
    %c2 = arith.constant 2 : index
    %c0_2 = arith.constant 0 : index
    %c0_3 = arith.constant 0 : index
    %2 = vector.load %arg5[%c2, %c0_2, %c0_3] : memref<3x8x4xbf16, #tpu.memory_space<vmem>>, vector<1x8x4xbf16>
    %3 = vector.shape_cast %2 : vector<1x8x4xbf16> to vector<8x4xbf16>
    %4 = arith.truncf %1 : vector<4x128xf32> to vector<4x128xbf16>
    %cst = arith.constant dense<0.000000e+00> : vector<8x128xf32>
    %5 = tpu.matmul %3, %4, %cst {dimension_numbers = #tpu.dot_dimension_numbers<[1], [0], [0], [1], [0, 0, 1, 1], [], []>} : vector<8x4xbf16>, vector<4x128xbf16>, vector<8x128xf32> -> vector<8x128xf32>
    %c2_i32 = arith.constant 2 : i32
    %6 = tpu.dynamic_rotate %1 by %c2_i32 dim 1 : vector<4x128xf32>, i32 -> vector<4x128xf32>
    %c0_4 = arith.constant 0 : index
    %c0_5 = arith.constant 0 : index
    %c0_6 = arith.constant 0 : index
    %7 = vector.load %arg5[%c0_4, %c0_5, %c0_6] : memref<3x8x4xbf16, #tpu.memory_space<vmem>>, vector<1x8x4xbf16>
    %8 = vector.shape_cast %7 : vector<1x8x4xbf16> to vector<8x4xbf16>
    %9 = arith.truncf %6 : vector<4x128xf32> to vector<4x128xbf16>
    %cst_7 = arith.constant dense<0.000000e+00> : vector<8x128xf32>
    %10 = tpu.matmul %8, %9, %cst_7 {dimension_numbers = #tpu.dot_dimension_numbers<[1], [0], [0], [1], [0, 0, 1, 1], [], []>} : vector<8x4xbf16>, vector<4x128xbf16>, vector<8x128xf32> -> vector<8x128xf32>
    %11 = arith.addf %5, %10 : vector<8x128xf32>
    %c1_i32 = arith.constant 1 : i32
    %12 = tpu.dynamic_rotate %1 by %c1_i32 dim 1 : vector<4x128xf32>, i32 -> vector<4x128xf32>
    %c1 = arith.constant 1 : index
    %c0_8 = arith.constant 0 : index
    %c0_9 = arith.constant 0 : index
    %13 = vector.load %arg5[%c1, %c0_8, %c0_9] : memref<3x8x4xbf16, #tpu.memory_space<vmem>>, vector<1x8x4xbf16>
    %14 = vector.shape_cast %13 : vector<1x8x4xbf16> to vector<8x4xbf16>
    %15 = arith.truncf %12 : vector<4x128xf32> to vector<4x128xbf16>
    %cst_10 = arith.constant dense<0.000000e+00> : vector<8x128xf32>
    %16 = tpu.matmul %14, %15, %cst_10 {dimension_numbers = #tpu.dot_dimension_numbers<[1], [0], [0], [1], [0, 0, 1, 1], [], []>} : vector<8x4xbf16>, vector<4x128xbf16>, vector<8x128xf32> -> vector<8x128xf32>
    %17 = arith.addf %11, %16 : vector<8x128xf32>
    %c0_11 = arith.constant 0 : index
    %c0_12 = arith.constant 0 : index
    %18 = vector.load %arg6[%c0_11, %c0_12] : memref<8x1xf32, #tpu.memory_space<vmem>>, vector<8x1xf32>
    %19 = vector.broadcast %18 : vector<8x1xf32> to vector<8x128xf32>
    %20 = arith.addf %17, %19 : vector<8x128xf32>
    %21 = arith.truncf %20 : vector<8x128xf32> to vector<8x128xbf16>
    %cst_13 = arith.constant 0.000000e+00 : bf16
    %22 = vector.broadcast %cst_13 : bf16 to vector<8x128xbf16>
    %23 = arith.minimumf %21, %22 : vector<8x128xbf16>
    %cst_14 = arith.constant 0.000000e+00 : bf16
    %24 = vector.broadcast %cst_14 : bf16 to vector<8x128xbf16>
    %25 = arith.cmpf ogt, %21, %24 : vector<8x128xbf16>
    %26 = math.exp %23 : vector<8x128xbf16>
    %cst_15 = arith.constant 1.000000e+00 : bf16
    %27 = vector.broadcast %cst_15 : bf16 to vector<8x128xbf16>
    %28 = arith.subf %26, %27 : vector<8x128xbf16>
    %29 = arith.select %25, %21, %28 : vector<8x128xi1>, vector<8x128xbf16>
    %c0_16 = arith.constant 0 : index
    %c0_17 = arith.constant 0 : index
    %c0_18 = arith.constant 0 : index
    %30 = vector.load %arg7[%c0_16, %c0_17, %c0_18] : memref<1x8x128xbf16, #tpu.memory_space<vmem>>, vector<1x8x128xbf16>
    %31 = vector.shape_cast %30 : vector<1x8x128xbf16> to vector<8x128xbf16>
    %32 = vector.shape_cast %29 : vector<8x128xbf16> to vector<1x8x128xbf16>
    tpu.vector_store %arg7[%c0_16, %c0_17, %c0_18], %32 {strides = array<i32>} : memref<1x8x128xbf16, #tpu.memory_space<vmem>>, vector<1x8x128xbf16>,
    %c0_19 = arith.constant 0 : index
    %c0_20 = arith.constant 0 : index
    %c0_21 = arith.constant 0 : index
    %c0_22 = arith.constant 0 : index
    %33 = vector.load %arg4[%c0_19, %c0_20, %c0_21, %c0_22] : memref<1x1x4x128xf32, #tpu.memory_space<vmem>>, vector<1x1x4x128xf32>
    %34 = vector.shape_cast %33 : vector<1x1x4x128xf32> to vector<4x128xf32>
    %35 = tpu.concatenate %34, %1 in 1 : vector<4x128xf32>, vector<4x128xf32> -> vector<4x256xf32>
    %36 = vector.extract_strided_slice %35 {offsets = [0, 128], sizes = [4, 128], strides = [1, 1]} : vector<4x256xf32> to vector<4x128xf32>
    %c2_23 = arith.constant 2 : index
    %c0_24 = arith.constant 0 : index
    %c0_25 = arith.constant 0 : index
    %37 = vector.load %arg5[%c2_23, %c0_24, %c0_25] : memref<3x8x4xbf16, #tpu.memory_space<vmem>>, vector<1x8x4xbf16>
    %38 = vector.shape_cast %37 : vector<1x8x4xbf16> to vector<8x4xbf16>
    %39 = arith.truncf %36 : vector<4x128xf32> to vector<4x128xbf16>
    %cst_26 = arith.constant dense<0.000000e+00> : vector<8x128xf32>
    %40 = tpu.matmul %38, %39, %cst_26 {dimension_numbers = #tpu.dot_dimension_numbers<[1], [0], [0], [1], [0, 0, 1, 1], [], []>} : vector<8x4xbf16>, vector<4x128xbf16>, vector<8x128xf32> -> vector<8x128xf32>
    %41 = vector.extract_strided_slice %35 {offsets = [0, 126], sizes = [4, 128], strides = [1, 1]} : vector<4x256xf32> to vector<4x128xf32>
    %c0_27 = arith.constant 0 : index
    %c0_28 = arith.constant 0 : index
    %c0_29 = arith.constant 0 : index
    %42 = vector.load %arg5[%c0_27, %c0_28, %c0_29] : memref<3x8x4xbf16, #tpu.memory_space<vmem>>, vector<1x8x4xbf16>
    %43 = vector.shape_cast %42 : vector<1x8x4xbf16> to vector<8x4xbf16>
    %44 = arith.truncf %41 : vector<4x128xf32> to vector<4x128xbf16>
    %cst_30 = arith.constant dense<0.000000e+00> : vector<8x128xf32>
    %45 = tpu.matmul %43, %44, %cst_30 {dimension_numbers = #tpu.dot_dimension_numbers<[1], [0], [0], [1], [0, 0, 1, 1], [], []>} : vector<8x4xbf16>, vector<4x128xbf16>, vector<8x128xf32> -> vector<8x128xf32>
    %46 = arith.addf %40, %45 : vector<8x128xf32>
    %47 = vector.extract_strided_slice %35 {offsets = [0, 127], sizes = [4, 128], strides = [1, 1]} : vector<4x256xf32> to vector<4x128xf32>
    %c1_31 = arith.constant 1 : index
    %c0_32 = arith.constant 0 : index
    %c0_33 = arith.constant 0 : index
    %48 = vector.load %arg5[%c1_31, %c0_32, %c0_33] : memref<3x8x4xbf16, #tpu.memory_space<vmem>>, vector<1x8x4xbf16>
    %49 = vector.shape_cast %48 : vector<1x8x4xbf16> to vector<8x4xbf16>
    %50 = arith.truncf %47 : vector<4x128xf32> to vector<4x128xbf16>
    %cst_34 = arith.constant dense<0.000000e+00> : vector<8x128xf32>
    %51 = tpu.matmul %49, %50, %cst_34 {dimension_numbers = #tpu.dot_dimension_numbers<[1], [0], [0], [1], [0, 0, 1, 1], [], []>} : vector<8x4xbf16>, vector<4x128xbf16>, vector<8x128xf32> -> vector<8x128xf32>
    %52 = arith.addf %46, %51 : vector<8x128xf32>
    %53 = vector.broadcast %18 : vector<8x1xf32> to vector<8x128xf32>
    %54 = arith.addf %52, %53 : vector<8x128xf32>
    %55 = arith.truncf %54 : vector<8x128xf32> to vector<8x128xbf16>
    %cst_35 = arith.constant 0.000000e+00 : bf16
    %56 = vector.broadcast %cst_35 : bf16 to vector<8x128xbf16>
    %57 = arith.minimumf %55, %56 : vector<8x128xbf16>
    %cst_36 = arith.constant 0.000000e+00 : bf16
    %58 = vector.broadcast %cst_36 : bf16 to vector<8x128xbf16>
    %59 = arith.cmpf ogt, %55, %58 : vector<8x128xbf16>
    %60 = math.exp %57 : vector<8x128xbf16>
    %cst_37 = arith.constant 1.000000e+00 : bf16
    %61 = vector.broadcast %cst_37 : bf16 to vector<8x128xbf16>
    %62 = arith.subf %60, %61 : vector<8x128xbf16>
    %63 = arith.select %59, %55, %62 : vector<8x128xi1>, vector<8x128xbf16>
    %c0_38 = arith.constant 0 : index
    %c0_39 = arith.constant 0 : index
    %c0_40 = arith.constant 0 : index
    %64 = vector.load %arg7[%c0_38, %c0_39, %c0_40] : memref<1x8x128xbf16, #tpu.memory_space<vmem>>, vector<1x8x128xbf16>
    %65 = vector.shape_cast %64 : vector<1x8x128xbf16> to vector<8x128xbf16>
    %66 = vector.shape_cast %63 : vector<8x128xbf16> to vector<1x8x128xbf16>
    tpu.vector_store %arg7[%c0_38, %c0_39, %c0_40], %66 {strides = array<i32>} : memref<1x8x128xbf16, #tpu.memory_space<vmem>>, vector<1x8x128xbf16>,
    return
  }
  func.func @transform_0(%arg0: i32, %arg1: i32, %arg2: i32) -> (i32, i32, i32) {
    %c0_i32 = arith.constant 0 : i32
    %c0_i32_0 = arith.constant 0 : i32
    return %arg1, %c0_i32, %arg2 : i32, i32, i32
  }
  func.func @transform_1(%arg0: i32, %arg1: i32, %arg2: i32) -> (i32, i32, i32, i32) {
    %c0_i32 = arith.constant 0 : i32
    %c0_i32_0 = arith.constant 0 : i32
    %c0_i32_1 = arith.constant 0 : i32
    return %arg1, %arg2, %c0_i32, %c0_i32_0 : i32, i32, i32, i32
  }
  func.func @transform_2(%arg0: i32, %arg1: i32, %arg2: i32) -> (i32, i32, i32) {
    %c0_i32 = arith.constant 0 : i32
    %c0_i32_0 = arith.constant 0 : i32
    %c0_i32_1 = arith.constant 0 : i32
    return %c0_i32, %arg0, %c0_i32_0 : i32, i32, i32
  }
  func.func @transform_3(%arg0: i32, %arg1: i32, %arg2: i32) -> (i32, i32) {
    %c0_i32 = arith.constant 0 : i32
    %c0_i32_0 = arith.constant 0 : i32
    return %arg0, %c0_i32 : i32, i32
  }
  func.func @transform_4(%arg0: i32, %arg1: i32, %arg2: i32) -> (i32, i32, i32) {
    %c0_i32 = arith.constant 0 : i32
    return %arg1, %arg0, %arg2 : i32, i32, i32
  }
}

</mosaic_0001>

<bundles_post_ra>
// kernel: tpu_custom_call.1
= control target key start
LH: loop header
LB: loop body
LE: loop exit
PB: predicated region body
PF: predicated region fallthrough
CT: control target
= control target key end

     0   :  { %9 = vsyncpa [#allocation3], 0  ;;  %s942_s0 = inlined_call_operand.vmem [shape: f32[2,4,16], index: 0, kind: input, shape index: {}]   ;;  %s943_s1 = inlined_call_operand.vmem [shape: f32[2,1,4,128], index: 1, kind: input, shape index: {}]   ;;  %s944_s2 = inlined_call_operand.vmem [shape: bf16[3,8,4], index: 2, kind: input, shape index: {}]   ;;  %s945_s3 = inlined_call_operand.vmem [shape: f32[8,1], index: 3, kind: input, shape index: {}]   ;;  %s946_s4 = inlined_call_operand.hbm [shape: bf16[2,8,16], index: 4, kind: output, shape index: {}]  }
   0x1   :  { %11 = vsyncpa [#allocation3 + $0x1], 0  ;;  %s810_s15 = smov 0   ;;  %s812_s16 = smov 0  }
   0x2   :  { %s814_s17 = smov 0   ;;  %s816_s18 = smov 0  }
   0x3   :  { %s818_s19 = smov 0   ;;  %s820_s20 = smov 0  }
   0x4 LB: > { %s613_s21 = sadd.s32 4294967295, %s780_s20   ;;  %s614_s22 = sadd.s32 4294967294, %s780_s20   ;;  %s780_s20 = sphi %s820_s20, %s17_s20   ;;  %s776_s19 = sphi %s818_s19, %s953_s19   ;;  %s772_s18 = sphi %s816_s18, %s952_s18   ;;  %s768_s17 = sphi %s814_s17, %s951_s17   ;;  %s764_s16 = sphi %s812_s16, %s950_s16   ;;  %s760_s15 = sphi %s810_s15, %s949_s15  }
   0x5   : > { %s32_s23 = sadd.s32 1, %s776_s19  ;;  %s155_s24 = sadd.s32 1, %s768_s17 }
   0x6   : > { %p34_p0 = scmp.ge.s32.totalorder %s32_s23, 2  ;;  %p165_p1 = scmp.ne.s32.totalorder %s768_s17, %s764_s16 }
   0x7   : > { %p166_p2 = scmp.eq.s32.totalorder %s613_s21, 1  ;;  %p171_p3 = scmp.ne.s32.totalorder %s764_s16, %s760_s15 }
   0x8   : > { %s955_s23 = smov (%p34_p0, %s32_s23), 0  ;;  %p172_p5 = scmp.eq.s32.totalorder %s614_s22, 1 }
   0x9   : > { %p850_p4 = por %p166_p2, %p165_p1  ;;  %s148_s26 = ssub.s32 %s776_s19, %s955_s23 }
   0xa   : > { %p619_p6 = scmp.ge.s32.totalorder %s780_s20, 1  ;;  %p153_p7 = scmp.eq.s32.totalorder %s148_s26, 0 }
   0xb   : > { %p857_p8 = por %p172_p5, %p171_p3  ;;  %p224_p9 = scmp.lt.s32.totalorder %s780_s20, 3 }
   0xc   : > { %s863_s28 = scalar_select %p153_p7, %s768_s17, %s155_s24  }
   0xd   : > { %p225_p10 = pnand %p619_p6, %p224_p9 }
   0xe   : > { %p267_p11 = scmp.lt.s32.totalorder (!%p225_p10), %s772_s18, 1  ;;  %s782_s11 = smov (!%p225_p10), 2  }
   0xf   : > { %228 = sbr.rel (%p225_p10) target bundleno = 325 (0x145), region = 36  ;;  %s783_s12 = smov (!%p225_p10), 1  }
  0x10   : > { %s722_s8 = scalar_lea.hbm (!%p225_p10), %s946_s4, 8 }
  0x14   : > { %s268_s29 = scalar_select %p267_p11, %s772_s18, 1  ;;  %vm302_vm0 = vcmask 1041408   ;;  %v623_v5 = vld [vmem:[%s944_s2 + $0x8] sm:$0xf]  ;;  %vm298_vm1 = vcmask 31744   ;;  %vm437_vm2 = vcmask 7168  }
  0x15   : > { %v632_v10 = vld [vmem:[%s944_s2 + $0x4] sm:$0xf]  ;;  %v784_v12 = vmov 0   ;;  %v296_v17 = vld [vmem:[%s944_s2] sm:$0xf]  ;;  %vm395_vm3 = vcmask 15360  }
  0x16   : > { %s621_s30 = sshll.u32 %s268_s29, 2  ;;  %v363_v11 = vld [vmem:[%s945_s3] sm:$0xff]  ;;  %697 = vset.pattern.permute.xlu0 %v784_v12  ;;  %v629_v26 = vld [vmem:[%s944_s2 + $0x8] sm:$0xf] }
  0x17   : > { %s273_s7 = scalar_lea.vmem %s942_s0, %s621_s30  ;;  %s280_s10 = scalar_lea.vmem %s943_s1, %s621_s30  ;;  %v626_v24 = vld [vmem:[%s944_s2 + $0x4] sm:$0xf]  ;;  %v387_v25 = vld [vmem:[%s944_s2] sm:$0xf] }
  0x18   : > { %v290_v0 = vld [vmem:[%s273_s7] sm:$0xf] }
  0x19   : > { %v385_v1 = vld [vmem:[%s280_s10] sm:$0xf]  ;;  %294 = vrot.lane.b32.xlu0 %v290_v0, %s782_s11  ;;  %v293_v3 = vpack.c.bf16 %v290_v0, %v290_v0 }
  0x1a   : > { %v388_v2 = vpack.c.bf16 %v385_v1, %v385_v1 }
  0x1b   : > { %v323_v4 = vsel %vm302_vm0, %v293_v3, 0 }
  0x1c   : > { %391 = vrot.lane.b32.xlu1 %v388_v2, %s782_s11  ;;  %433 = vrot.lane.b32.xlu2 %v388_v2, %s783_s12 }
  0x1d   : > { %332 = vmatpush.bf16.msra.mxu1 %v323_v4 }
  0x20   : > { %625 = vmatmul.msk.bf16.vlgmr.msra.gmra.mxu1 %vm298_vm1, %v623_v5 }
  0x21   : > { %338 = vrot.lane.b32.xlu0 %v290_v0, %s783_s12 }
  0x24   : > { %393 = vrot.lane.b32.xlu1 %v293_v3, %s782_s11  ;;  %435 = vrot.lane.b32.xlu2 %v293_v3, %s783_s12  ;;  %s264_s11 = sand.u32 1, %s764_s16   ;;  %s636_s12 = sshll.u32 %s772_s18, 2 }
  0x25   : > { %s620_s13 = sshll.u32 %s264_s11, 2  ;;  %s488_s22 = scalar_lea.hbm %s946_s4, %s636_s12 }
  0x26   : > { %s266_s24 = scalar_lea.vmem [#allocation2], %s620_s13  ;;  %s492_s29 = sshll.u32 %s488_s22, 4  ;;  %s493_s29 = int_to_ptr.hbm [resolvable:$true] %s492_s29 }
  0x27   : > { %s490_s26 = sshll.u32 %s266_s24, 4  ;;  %s476_s18 = scalar_lea.sflag [#allocation3], %s264_s11  ;;  %s491_s26 = int_to_ptr.vmem [resolvable:$true] %s490_s26 }
  0x28   : > { %s716_s30 = sshra.s32 %s493_s29, 4  ;;  %s717_s30 = int_to_ptr.hbm [resolvable:$true] %s716_s30 }
  0x29   : > { %366 = vperm.xlu0 %697, %v363_v11   ;;  %s718_s5 = scalar_lea.hbm %s717_s30, 4  ;;  %p723_p1 = scmp.lt.s32.totalorder %s717_s30, %s946_s4 }
  0x2a   : > { %p719_p12 = scmp.ne.s32.totalorder %s717_s30, %s718_s5  ;;  %p724_p2 = scmp.lt.s32.totalorder %s722_s8, %s718_s5 }
  0x2c   : > { %p720_p13 = pnand %p719_p12, %p850_p4  ;;  %p725_p3 = por %p724_p2, %p723_p1 }
  0x2e   : > { %p721_p0 = pneg %p720_p13 }
  0x30   : > { %p726_p5 = pnand %p725_p3, %p721_p0 }
  0x76   : > { %v434_v6 = vpop.permute.xlu2 %433 }
  0x7e   : > { %v436_v7 = vpop.permute.xlu2 %435 }
  0x7f   : > { %v438_v8 = vsel %vm437_vm2, %v434_v6, %v436_v7 }
  0x80   : > { %v443_v9 = vsel %vm302_vm0, %v438_v8, 0 }
  0x81   : > { %452 = vmatpush.bf16.msrb.mxu1 %v443_v9 }
  0x84   : > { %633 = vmatmul.msk.bf16.vlgmr.msrb.gmra.mxu1 %vm298_vm1, %v632_v10 }
  0x8b   : > { %v295_v13 = vpop.permute.xlu0 %294 }
  0x8c   : > { %v297_v14 = vpack.c.bf16 %v295_v13, %v295_v13 }
  0x8e   : > { %v392_v15 = vpop.permute.xlu1 %391  ;;  %v304_v16 = vsel %vm302_vm0, %v297_v14, 0 }
  0x8f   : > { %313 = vmatpush.bf16.msra.mxu0 %v304_v16 }
  0x92   : > { %624 = vmatmul.msk.bf16.vlgmr.msra.gmra.mxu0 %vm298_vm1, %v296_v17 }
  0x93   : > { %426 = vmatpush.bf16.msrb.mxu0 %v323_v4  ;;  %v339_v18 = vpop.permute.xlu0 %338 }
  0x94   : > { %v342_v19 = vpack.c.bf16 %v339_v18, %v339_v18 }
  0x96   : > { %v394_v20 = vpop.permute.xlu1 %393  ;;  %v347_v21 = vsel %vm302_vm0, %v342_v19, 0 }
  0x97   : > { %v396_v22 = vsel %vm395_vm3, %v392_v15, %v394_v20  ;;  %356 = vmatpush.bf16.msra.mxu2 %v347_v21 }
  0x98   : > { %v401_v23 = vsel %vm302_vm0, %v396_v22, 0 }
  0x99   : > { %410 = vmatpush.bf16.msra.mxu3 %v401_v23 }
  0x9a   : > { %627 = vmatmul.msk.bf16.vlgmr.msra.gmra.mxu2 %vm298_vm1, %v626_v24 }
  0x9b   : > { %v367_v35 = vpop.permute.xlu0 %366 }
  0x9c   : > { %630 = vmatmul.msk.bf16.vlgmr.msra.gmra.mxu3 %vm298_vm1, %v387_v25 }
  0x9d   : > { %v334_v27 = vpop.f32.mrf.mxu1 }
  0xa2   : > { %631 = vmatmul.msk.bf16.vlgmr.msrb.gmra.mxu0 %vm298_vm1, %v629_v26 }
  0xa5   : > { %v336_v28 = vpop.f32.mrf.mxu1 }
 0x101   : > { %v454_v29 = vpop.f32.mrf.mxu1 }
 0x109   : > { %v456_v30 = vpop.f32.mrf.mxu1 }
 0x10f   : > { %v315_v31 = vpop.f32.mrf.mxu0 }
 0x110   : > { %v335_v33 = vadd.f32 %v334_v27, %v315_v31 }
 0x117   : > { %v317_v32 = vpop.f32.mrf.mxu0 }
 0x11d   : > { %v358_v34 = vpop.f32.mrf.mxu2 }
 0x11e   : > { %v362_v36 = vadd.f32 %v358_v34, %v335_v33 }
 0x11f   : > { %v412_v37 = vpop.f32.mrf.mxu3  ;;  %v428_v38 = vpop.f32.mrf.mxu0 }
 0x120   : > { %v369_v39 = vadd.f32 %v367_v35, %v362_v36  ;;  %v429_v40 = vadd.f32 %v428_v38, %v412_v37 }
 0x122   : > { %v370_v41 = vpack.c.bf16 %v369_v39, %v369_v39  ;;  %v458_v42 = vadd.f32 %v454_v29, %v429_v40 }
 0x124   : > { %v371_v43 = vunpack.c.l.bf16 %v370_v41  ;;  %v459_v44 = vadd.f32 %v458_v42, %v367_v35 }
 0x125   : > { %v360_v45 = vpop.f32.mrf.mxu2 }
 0x126   : > { %v372_v46 = vmin.f32 %v371_v43, 0.0  ;;  %v460_v47 = vpack.c.bf16 %v459_v44, %v459_v44  ;;  %vm374_vm4 = vcmp.gt.f32.partialorder %v371_v43, 0.0 }
 0x127   : > { %v414_v48 = vpop.f32.mrf.mxu3  ;;  %v430_v49 = vpop.f32.mrf.mxu0  ;;  %vm382_vm5 = vmpackc.low %vm374_vm4, %vm374_vm4 }
 0x128   : > { %v373_v50 = vpack.c.bf16 %v372_v46, %v372_v46  ;;  %v461_v51 = vunpack.c.l.bf16 %v460_v47 }
 0x12a   : > { %v375_v52 = vunpack.c.l.bf16 %v373_v50  ;;  %v462_v53 = vmin.f32 %v461_v51, 0.0  ;;  %vm464_vm6 = vcmp.gt.f32.partialorder %v461_v51, 0.0 }
 0x12b   : > { %vm472_vm7 = vmpackc.low %vm464_vm6, %vm464_vm6 }
 0x12c   : > { %v376_v54 = vmul.f32 1.442695, %v375_v52  ;;  %v463_v55 = vpack.c.bf16 %v462_v53, %v462_v53 }
 0x12e   : > { %698 = vpow2.f32 %v376_v54  ;;  %v465_v56 = vunpack.c.l.bf16 %v463_v55 }
 0x130   : > { %v466_v57 = vmul.f32 1.442695, %v465_v56 }
 0x132   : > { %700 = vpow2.f32 %v466_v57 }
 0x134   : > { %v699_v58 = vpop.eup %698 }
 0x135   : > { %v378_v59 = vpack.c.bf16 %v699_v58, %v699_v58 }
 0x137   : > { %v379_v60 = vunpack.c.l.bf16 %v378_v59 }
 0x138   : > { %v701_v61 = vpop.eup %700 }
 0x139   : > { %v628_v62 = vadd.f32 -1.0, %v379_v60  ;;  %v468_v63 = vpack.c.bf16 %v701_v61, %v701_v61 }
 0x13b   : > { %v381_v0 = vpack.c.bf16 %v628_v62, %v628_v62  ;;  %v469_v1 = vunpack.c.l.bf16 %v468_v63 }
 0x13d   : > { %v383_v2 = vsel %vm382_vm5, %v370_v41, %v381_v0  ;;  %v634_v3 = vadd.f32 -1.0, %v469_v1 }
 0x13e   : > { %384 = vst [vmem:[%s266_s24] sm:$0xf] %v383_v2 }
 0x13f   : > { %v471_v4 = vpack.c.bf16 %v634_v3, %v634_v3 }
 0x141   : > { %v473_v5 = vsel %vm472_vm7, %v460_v47, %v471_v4 }
 0x142   : > { %474 = vst [vmem:[%s266_s24] sm:$0xf] %v473_v5 }
 0x143   : > { %729 = shalt.err (!%p726_p5)
}
 0x144   : > { %639 = dma.vmem_to_hbm [thread:$0]  (%p850_p4), %s491_s26, 64, %s493_s29, %s476_s18  }
 0x145 PF: > { %p645_p6 = scmp.ge.s32.totalorder %s780_s20, 2  ;;  %s504_s11 = sand.u32 1, %s760_s15  }
 0x146   : > { %s505_s12 = scalar_lea.sflag [#allocation3], %s504_s11 }
 0x147   : > { %p642_p7 = pnand %p645_p6, %p857_p8 }
 0x149   : > { %p643_p9 = pneg %p642_p7 }
 0x14b   : > { %755 = dma.done.wait (%p643_p9), %s505_s12, 64  }
 0x14c   : > { %757 = vsyncadd (%p643_p9), %s505_s12, 4294967232  ;;  %s17_s20 = sadd.s32 1, %s780_s20   ;;  %s949_s15 = smov %s764_s16 }
 0x14d   : > { %p14_p10 = scmp.ge.s32.totalorder %s17_s20, 4   ;;  %s950_s16 = smov %s768_s17 }
 0x14e   : > { %s951_s17 = smov %s863_s28  ;;  %s952_s18 = smov %s776_s19 }
 0x14f   : > { %s953_s19 = smov %s955_s23  ;;  %16 = sbr.rel (!%p14_p10) target bundleno = 4 (0x4), region = 82 }
 0x154   :  { %511 = vsyncpa [#allocation3], 1 }
 0x155   :  { %513 = vsyncpa [#allocation3 + $0x1], 1 }

</bundles_post_ra>
